<compile_context>
chip_gen: v6e
topology: v6e:2x2x1
jax: 0.10.0
libtpu: 0.0.40
codegen_flags: <defaults>
</compile_context>

<pallas_src>
import functools

import jax
import jax.numpy as jnp
from jax import lax
from jax.experimental import pallas as pl
from jax.experimental.pallas import tpu as pltpu


# ----------------------------------------------------------------------------
# Fused attention kernel (one batch element per grid step, all heads at once)
# ----------------------------------------------------------------------------
def _make_attention_kernel(heads, dim_head, scale, project_out):
    inner = heads * dim_head

    def kernel(*refs):
        if project_out:
            x_ref, wqkv_ref, wo_ref, bo_ref, o_ref = refs
        else:
            x_ref, wqkv_ref, o_ref = refs

        x = x_ref[0].astype(jnp.float32)                               # (N, D)
        wqkv = wqkv_ref[...].astype(jnp.float32)                       # (D, 3*inner)

        # One big MXU-friendly bias-free QKV projection (better than 3*heads
        # skinny matmuls with K = dim_head).
        qkv = jnp.dot(x, wqkv, preferred_element_type=jnp.float32)     # (N, 3*inner)

        # Fold the softmax scale into Q: N*inner muls instead of heads*N*N.
        q = qkv[:, 0 * inner:1 * inner] * scale
        k = qkv[:, 1 * inner:2 * inner]
        v = qkv[:, 2 * inner:3 * inner]

        head_outs = []
        for h in range(heads):                                         # static unroll
            sl = slice(h * dim_head, (h + 1) * dim_head)
            qh, kh, vh = q[:, sl], k[:, sl], v[:, sl]
            # Q @ K^T without materialising a transposed K: contract last dims.
            s = lax.dot_general(qh, kh, (((1,), (1,)), ((), ())),
                                preferred_element_type=jnp.float32)    # (N, N)
            s = s - jnp.max(s, axis=-1, keepdims=True)                 # stable softmax
            p = jnp.exp(s)                                             # EUP
            denom = jnp.sum(p, axis=-1, keepdims=True)                 # (N, 1), XLU
            oh = jnp.dot(p, vh, preferred_element_type=jnp.float32)    # (N, Dh), MXU
            # Normalise after PV: (N, Dh) muls with an approx reciprocal (EUP)
            # instead of (N, N) divides on the probabilities.
            head_outs.append(oh * pl.reciprocal(denom, approx=True))

        attn_out = head_outs[0] if heads == 1 else jnp.concatenate(head_outs, axis=-1)

        if project_out:
            wo = wo_ref[...].astype(jnp.float32)                       # (inner, D)
            out = jnp.dot(attn_out, wo, preferred_element_type=jnp.float32)
            out = out + bo_ref[...].astype(jnp.float32)                # (1, D) broadcast
        else:
            out = attn_out
        o_ref[0] = out.astype(o_ref.dtype)

    return kernel


def attention_forward(x, w_qkv, w_out=None, b_out=None, *, heads, dim_head):
    """Forward pass of the ViViT Attention module.

    x      : (B, N, D)
    w_qkv  : (D, 3*heads*dim_head)   -- nn.Linear(dim, inner*3, bias=False) weight^T
    w_out  : (heads*dim_head, D)     -- nn.Linear(inner, dim) weight^T (if project_out)
    b_out  : (D,)                    -- nn.Linear(inner, dim) bias      (if project_out)
    Dropout p = 0.0 -> identity.
    """
    B, N, D = x.shape
    inner = heads * dim_head
    assert w_qkv.shape == (D, 3 * inner)
    project_out = not (heads == 1 and dim_head == D)
    scale = dim_head ** (-0.5)

    kern = _make_attention_kernel(heads, dim_head, scale, project_out)

    x_spec = pl.BlockSpec((1, N, D), lambda b: (b, 0, 0))
    # Weights: constant block index across the grid -> DMA'd once, VMEM-resident.
    wqkv_spec = pl.BlockSpec((D, 3 * inner), lambda b: (0, 0))

    out_dim = D if project_out else inner
    out_spec = pl.BlockSpec((1, N, out_dim), lambda b: (b, 0, 0))

    if project_out:
        assert w_out.shape == (inner, D) and b_out.shape == (D,)
        in_specs = [x_spec, wqkv_spec,
                    pl.BlockSpec((inner, D), lambda b: (0, 0)),
                    pl.BlockSpec((1, D), lambda b: (0, 0))]
        args = (x, w_qkv, w_out, b_out.reshape(1, D))
    else:
        in_specs = [x_spec, wqkv_spec]
        args = (x, w_qkv)

    return pl.pallas_call(
        kern,
        out_shape=jax.ShapeDtypeStruct((B, N, out_dim), x.dtype),
        grid=(B,),
        in_specs=in_specs,
        out_specs=out_spec,
        compiler_params=pltpu.CompilerParams(
            dimension_semantics=("parallel",),      # megacore shards the batch
            vmem_limit_bytes=32 * 1024 * 1024,      # covers v5e's 16 MiB default
        ),
    )(*args)


# ----------------------------------------------------------------------------
# Pure-JAX reference (mirrors the PyTorch module) for a correctness check
# ----------------------------------------------------------------------------
def attention_reference(x, w_qkv, w_out, b_out, *, heads, dim_head):
    B, N, D = x.shape
    inner = heads * dim_head
    qkv = x @ w_qkv
    q, k, v = jnp.split(qkv, 3, axis=-1)

    def split_heads(t):
        return t.reshape(B, N, heads, dim_head).transpose(0, 2, 1, 3)

    q, k, v = map(split_heads, (q, k, v))
    dots = jnp.einsum('bhid,bhjd->bhij', q, k) * (dim_head ** (-0.5))
    attn = jax.nn.softmax(dots, axis=-1)
    out = jnp.einsum('bhij,bhjd->bhid', attn, v)
    out = out.transpose(0, 2, 1, 3).reshape(B, N, inner)
    return out @ w_out + b_out


# ----------------------------------------------------------------------------
# Demo
# ----------------------------------------------------------------------------
if __name__ == "__main__":
    batch, seq, dim = 2, 8, 32
    heads, dim_head = 2, 16
    inner = heads * dim_head

    key = jax.random.PRNGKey(0)
    kx, k0, k1 = jax.random.split(key, 3)
    x = jax.random.normal(kx, (batch, seq, dim), dtype=jnp.float32)
    w_qkv = 0.05 * jax.random.normal(k0, (dim, 3 * inner), dtype=jnp.float32)
    w_out = 0.05 * jax.random.normal(k1, (inner, dim), dtype=jnp.float32)
    b_out = jnp.zeros((dim,), dtype=jnp.float32)

    fwd = jax.jit(functools.partial(attention_forward, heads=heads, dim_head=dim_head))
    out = fwd(x, w_qkv, w_out, b_out)
    jax.block_until_ready(out)

    ref = attention_reference(x, w_qkv, w_out, b_out, heads=heads, dim_head=dim_head)
    assert out.shape == (batch, seq, dim), out.shape
    assert bool(jnp.all(jnp.isfinite(out)))
    # approx reciprocal in the softmax normalisation -> relaxed tolerance
    assert bool(jnp.allclose(out, ref, rtol=1e-2, atol=1e-2)), \
        float(jnp.max(jnp.abs(out - ref)))

    print("KERNEL_OK")
</pallas_src>

<mosaic_0001>
module attributes {stable_mosaic.version = 11 : i64} {
  func.func @kernel(%arg0: i32, %arg1: memref<1x8x32xf32, #tpu.memory_space<vmem>>, %arg2: memref<32x96xf32, #tpu.memory_space<vmem>>, %arg3: memref<32x32xf32, #tpu.memory_space<vmem>>, %arg4: memref<1x32xf32, #tpu.memory_space<vmem>>, %arg5: memref<1x8x32xf32, #tpu.memory_space<vmem>>) attributes {dimension_semantics = [#tpu.dimension_semantics<parallel>], iteration_bounds = array<i64: 2>, scalar_prefetch = 0 : i64, scratch_operands = 0 : i64, tpu.core_type = #tpu.core_type<tc>, window_params = [{transform_indices = @transform_0, window_bounds = array<i64: 1, 8, 32>}, {pipeline_mode = #tpu.pipeline_mode<synchronous>, transform_indices = @transform_1, window_bounds = array<i64: 32, 96>}, {pipeline_mode = #tpu.pipeline_mode<synchronous>, transform_indices = @transform_2, window_bounds = array<i64: 32, 32>}, {pipeline_mode = #tpu.pipeline_mode<synchronous>, transform_indices = @transform_3, window_bounds = array<i64: 1, 32>}, {transform_indices = @transform_4, window_bounds = array<i64: 1, 8, 32>}]} {
    %c0 = arith.constant 0 : index
    %c0_0 = arith.constant 0 : index
    %c0_1 = arith.constant 0 : index
    %0 = vector.load %arg1[%c0, %c0_0, %c0_1] : memref<1x8x32xf32, #tpu.memory_space<vmem>>, vector<1x8x32xf32>
    %1 = vector.shape_cast %0 : vector<1x8x32xf32> to vector<8x32xf32>
    %c0_2 = arith.constant 0 : index
    %c0_3 = arith.constant 0 : index
    %2 = vector.load %arg2[%c0_2, %c0_3] : memref<32x96xf32, #tpu.memory_space<vmem>>, vector<32x96xf32>
    %cst = arith.constant dense<0.000000e+00> : vector<8x96xf32>
    %3 = tpu.matmul %1, %2, %cst {dimension_numbers = #tpu.dot_dimension_numbers<[1], [0], [0], [1], [0, 0, 1, 1], [], []>} : vector<8x32xf32>, vector<32x96xf32>, vector<8x96xf32> -> vector<8x96xf32>
    %4 = vector.extract_strided_slice %3 {offsets = [0, 0], sizes = [8, 32], strides = [1, 1]} : vector<8x96xf32> to vector<8x32xf32>
    %cst_4 = arith.constant 2.500000e-01 : f32
    %5 = vector.broadcast %cst_4 : f32 to vector<8x32xf32>
    %6 = arith.mulf %4, %5 : vector<8x32xf32>
    %7 = vector.extract_strided_slice %3 {offsets = [0, 32], sizes = [8, 32], strides = [1, 1]} : vector<8x96xf32> to vector<8x32xf32>
    %8 = vector.extract_strided_slice %3 {offsets = [0, 64], sizes = [8, 32], strides = [1, 1]} : vector<8x96xf32> to vector<8x32xf32>
    %9 = vector.extract_strided_slice %6 {offsets = [0, 0], sizes = [8, 16], strides = [1, 1]} : vector<8x32xf32> to vector<8x16xf32>
    %10 = vector.extract_strided_slice %7 {offsets = [0, 0], sizes = [8, 16], strides = [1, 1]} : vector<8x32xf32> to vector<8x16xf32>
    %11 = vector.extract_strided_slice %8 {offsets = [0, 0], sizes = [8, 16], strides = [1, 1]} : vector<8x32xf32> to vector<8x16xf32>
    %cst_5 = arith.constant dense<0.000000e+00> : vector<8x8xf32>
    %12 = tpu.matmul %9, %10, %cst_5 {dimension_numbers = #tpu.dot_dimension_numbers<[1], [1], [0], [0], [0, 0, 1, 0], [], []>} : vector<8x16xf32>, vector<8x16xf32>, vector<8x8xf32> -> vector<8x8xf32>
    %cst_6 = arith.constant dense<0xFF800000> : vector<8xf32>
    %13 = vector.multi_reduction <maximumf>, %12, %cst_6 [1] : vector<8x8xf32> to vector<8xf32>
    %14 = vector.shape_cast %13 : vector<8xf32> to vector<8x1xf32>
    %15 = vector.broadcast %14 : vector<8x1xf32> to vector<8x8xf32>
    %16 = arith.subf %12, %15 : vector<8x8xf32>
    %17 = math.exp %16 : vector<8x8xf32>
    %cst_7 = arith.constant dense<0.000000e+00> : vector<8xf32>
    %18 = vector.multi_reduction <add>, %17, %cst_7 [1] : vector<8x8xf32> to vector<8xf32>
    %19 = vector.shape_cast %18 : vector<8xf32> to vector<8x1xf32>
    %cst_8 = arith.constant dense<0.000000e+00> : vector<8x16xf32>
    %20 = tpu.matmul %17, %11, %cst_8 {dimension_numbers = #tpu.dot_dimension_numbers<[1], [0], [0], [1], [0, 0, 1, 1], [], []>} : vector<8x8xf32>, vector<8x16xf32>, vector<8x16xf32> -> vector<8x16xf32>
    %21 = tpu.reciprocal %19 {approx = true} : vector<8x1xf32> -> vector<8x1xf32>
    %22 = vector.broadcast %21 : vector<8x1xf32> to vector<8x16xf32>
    %23 = arith.mulf %20, %22 : vector<8x16xf32>
    %24 = vector.extract_strided_slice %6 {offsets = [0, 16], sizes = [8, 16], strides = [1, 1]} : vector<8x32xf32> to vector<8x16xf32>
    %25 = vector.extract_strided_slice %7 {offsets = [0, 16], sizes = [8, 16], strides = [1, 1]} : vector<8x32xf32> to vector<8x16xf32>
    %26 = vector.extract_strided_slice %8 {offsets = [0, 16], sizes = [8, 16], strides = [1, 1]} : vector<8x32xf32> to vector<8x16xf32>
    %cst_9 = arith.constant dense<0.000000e+00> : vector<8x8xf32>
    %27 = tpu.matmul %24, %25, %cst_9 {dimension_numbers = #tpu.dot_dimension_numbers<[1], [1], [0], [0], [0, 0, 1, 0], [], []>} : vector<8x16xf32>, vector<8x16xf32>, vector<8x8xf32> -> vector<8x8xf32>
    %cst_10 = arith.constant dense<0xFF800000> : vector<8xf32>
    %28 = vector.multi_reduction <maximumf>, %27, %cst_10 [1] : vector<8x8xf32> to vector<8xf32>
    %29 = vector.shape_cast %28 : vector<8xf32> to vector<8x1xf32>
    %30 = vector.broadcast %29 : vector<8x1xf32> to vector<8x8xf32>
    %31 = arith.subf %27, %30 : vector<8x8xf32>
    %32 = math.exp %31 : vector<8x8xf32>
    %cst_11 = arith.constant dense<0.000000e+00> : vector<8xf32>
    %33 = vector.multi_reduction <add>, %32, %cst_11 [1] : vector<8x8xf32> to vector<8xf32>
    %34 = vector.shape_cast %33 : vector<8xf32> to vector<8x1xf32>
    %cst_12 = arith.constant dense<0.000000e+00> : vector<8x16xf32>
    %35 = tpu.matmul %32, %26, %cst_12 {dimension_numbers = #tpu.dot_dimension_numbers<[1], [0], [0], [1], [0, 0, 1, 1], [], []>} : vector<8x8xf32>, vector<8x16xf32>, vector<8x16xf32> -> vector<8x16xf32>
    %36 = tpu.reciprocal %34 {approx = true} : vector<8x1xf32> -> vector<8x1xf32>
    %37 = vector.broadcast %36 : vector<8x1xf32> to vector<8x16xf32>
    %38 = arith.mulf %35, %37 : vector<8x16xf32>
    %39 = tpu.concatenate %23, %38 in 1 : vector<8x16xf32>, vector<8x16xf32> -> vector<8x32xf32>
    %c0_13 = arith.constant 0 : index
    %c0_14 = arith.constant 0 : index
    %40 = vector.load %arg3[%c0_13, %c0_14] : memref<32x32xf32, #tpu.memory_space<vmem>>, vector<32x32xf32>
    %cst_15 = arith.constant dense<0.000000e+00> : vector<8x32xf32>
    %41 = tpu.matmul %39, %40, %cst_15 {dimension_numbers = #tpu.dot_dimension_numbers<[1], [0], [0], [1], [0, 0, 1, 1], [], []>} : vector<8x32xf32>, vector<32x32xf32>, vector<8x32xf32> -> vector<8x32xf32>
    %c0_16 = arith.constant 0 : index
    %c0_17 = arith.constant 0 : index
    %42 = vector.load %arg4[%c0_16, %c0_17] : memref<1x32xf32, #tpu.memory_space<vmem>>, vector<1x32xf32>
    %43 = vector.broadcast %42 : vector<1x32xf32> to vector<8x32xf32>
    %44 = arith.addf %41, %43 : vector<8x32xf32>
    %c0_18 = arith.constant 0 : index
    %c0_19 = arith.constant 0 : index
    %c0_20 = arith.constant 0 : index
    %45 = vector.load %arg5[%c0_18, %c0_19, %c0_20] : memref<1x8x32xf32, #tpu.memory_space<vmem>>, vector<1x8x32xf32>
    %46 = vector.shape_cast %45 : vector<1x8x32xf32> to vector<8x32xf32>
    %47 = vector.shape_cast %44 : vector<8x32xf32> to vector<1x8x32xf32>
    tpu.vector_store %arg5[%c0_18, %c0_19, %c0_20], %47 {strides = array<i32>} : memref<1x8x32xf32, #tpu.memory_space<vmem>>, vector<1x8x32xf32>,
    return
  }
  func.func @transform_0(%arg0: i32) -> (i32, i32, i32) {
    %c0_i32 = arith.constant 0 : i32
    %c0_i32_0 = arith.constant 0 : i32
    %c0_i32_1 = arith.constant 0 : i32
    return %arg0, %c0_i32, %c0_i32_0 : i32, i32, i32
  }
  func.func @transform_1(%arg0: i32) -> (i32, i32) {
    %c0_i32 = arith.constant 0 : i32
    %c0_i32_0 = arith.constant 0 : i32
    %c0_i32_1 = arith.constant 0 : i32
    return %c0_i32, %c0_i32_0 : i32, i32
  }
  func.func @transform_2(%arg0: i32) -> (i32, i32) {
    %c0_i32 = arith.constant 0 : i32
    %c0_i32_0 = arith.constant 0 : i32
    %c0_i32_1 = arith.constant 0 : i32
    return %c0_i32, %c0_i32_0 : i32, i32
  }
  func.func @transform_3(%arg0: i32) -> (i32, i32) {
    %c0_i32 = arith.constant 0 : i32
    %c0_i32_0 = arith.constant 0 : i32
    %c0_i32_1 = arith.constant 0 : i32
    return %c0_i32, %c0_i32_0 : i32, i32
  }
  func.func @transform_4(%arg0: i32) -> (i32, i32, i32) {
    %c0_i32 = arith.constant 0 : i32
    %c0_i32_0 = arith.constant 0 : i32
    %c0_i32_1 = arith.constant 0 : i32
    return %arg0, %c0_i32, %c0_i32_0 : i32, i32, i32
  }
}

</mosaic_0001>

<bundles_post_ra>
// kernel: attention_forward.1
= control target key start
LH: loop header
LB: loop body
LE: loop exit
PB: predicated region body
PF: predicated region fallthrough
CT: control target
= control target key end

     0   :  { %9 = vsyncpa [#allocation3], 0  ;;  %s1422_s0 = inlined_call_operand.hbm [shape: f32[2,8,32], index: 0, kind: input, shape index: {}]   ;;  %s1423_s1 = inlined_call_operand.hbm [shape: f32[32,96], index: 1, kind: input, shape index: {}]   ;;  %s1424_s2 = inlined_call_operand.hbm [shape: f32[32,32], index: 2, kind: input, shape index: {}]   ;;  %s1425_s3 = inlined_call_operand.vmem [shape: f32[1,32], index: 3, kind: input, shape index: {}]   ;;  %s1426_s4 = inlined_call_operand.hbm [shape: f32[2,8,32], index: 4, kind: output, shape index: {}]  }
   0x1   :  { %11 = vsyncpa [#allocation3 + $0x1], 0 }
   0x2   :  { %12 = vsyncpa [#allocation6], 0 }
   0x3   :  { %13 = vsyncpa [#allocation4], 0 }
   0x4   :  { %15 = vsyncpa [#allocation4 + $0x1], 0  ;;  %s1206_s15 = smov 0   ;;  %s1208_s16 = smov 0  }
   0x5   :  { %s1210_s17 = smov 0   ;;  %s1212_s18 = smov 0  }
   0x6 LB: > { %s1227_s19 = sadd.s32 4294967295, %s1165_s18   ;;  %s847_s20 = sadd.s32 4294967294, %s1165_s18   ;;  %s1165_s18 = sphi %s1212_s18, %s1448_s18   ;;  %s1161_s17 = sphi %s1210_s17, %s1447_s17   ;;  %s1157_s16 = sphi %s1208_s16, %s1446_s16   ;;  %s1153_s15 = sphi %s1206_s15, %s1445_s15  }
   0x7   : > { %p41_p0 = scmp.ne.s32.totalorder %s1157_s16, %s1153_s15  ;;  %p1427_p1 = scmp.eq.s32.totalorder %s1227_s19, 0 }
   0x8   : > { %p134_p3 = scmp.eq.s32.totalorder %s847_s20, 1  ;;  %p848_p5 = scmp.ge.s32.totalorder %s1165_s18, 1 }
   0x9   : > { %p1236_p4 = por %p1427_p1, %p41_p0  ;;  %p141_p7 = scmp.lt.s32.totalorder %s1165_s18, 3 }
   0xa   : > { %p1241_p6 = por %p134_p3, %p41_p0  ;;  %s1167_s24 = smov [#allocation5]  }
   0xb   : > { %s1431_s21 = scalar_select %p1236_p4, 1, 0 }
   0xc   : > { %s1432_s22 = scalar_select %p1241_p6, 1, 0 }
   0xd   : > { %p1246_p8 = pnand %p848_p5, %p141_p7  ;;  %s153_s25 = sshll.u32 %s1167_s24, 4  ;;  %s154_s25 = int_to_ptr.vmem [resolvable:$true] %s153_s25 }
   0xe   : > { %s1168_s27 = smov [#allocation7]   ;;  %s1028_s29 = scalar_lea.vmem %s154_s25, 512 }
   0xf   : > { %s1433_s23 = scalar_select %p1246_p8, 1, 0 }
  0x10   : > { %p944_p9 = pneg %p1246_p8  ;;  %s166_s28 = sshll.u32 %s1168_s27, 4  ;;  %s167_s28 = int_to_ptr.vmem [resolvable:$true] %s166_s28 }
  0x11   : > { %p1029_p13 = scmp.ne.s32.totalorder %s154_s25, %s1028_s29  ;;  %p1036_p5 = scmp.lt.s32.totalorder %s154_s25, %s154_s25 }
  0x12   : > { %p1255_p11 = pnand %p944_p9, %p1427_p1  ;;  %p1037_p7 = scmp.lt.s32.totalorder %s1028_s29, %s1028_s29 }
  0x14   : > { %p1019_p12 = pneg %p1255_p11  ;;  %p1038_p10 = por %p1037_p7, %p1036_p5 }
  0x16   : > { %p1031_p0 = pnand %p1029_p13, %p1019_p12 }
  0x18   : > { %p1032_p3 = pneg %p1031_p0 }
  0x1a   : > { %p1039_p9 = pnand %p1038_p10, %p1032_p3 }
  0x1c   : > { %1042 = shalt.err (!%p1039_p9)
}
  0x1d   : > { %s1169_s30 = smov 128   ;;  %s1170_s5 = smov 8  }
  0x1e   : > { %947 = dma.hbm_to_vmem [thread:$0]  (!%p1255_p11), %s1423_s1, 512, %s154_s25, [#allocation6], %s1169_s30, %s1169_s30, %s1170_s5  }
  0x1f   : > { %s1054_s8 = scalar_lea.vmem %s167_s28, 512  ;;  %p1062_p2 = scmp.lt.s32.totalorder %s167_s28, %s167_s28 }
  0x20   : > { %p1055_p1 = scmp.ne.s32.totalorder %s167_s28, %s1054_s8  ;;  %p1063_p6 = scmp.lt.s32.totalorder %s1054_s8, %s1054_s8 }
  0x22   : > { %p1057_p13 = pnand %p1055_p1, %p1019_p12  ;;  %p1064_p5 = por %p1063_p6, %p1062_p2 }
  0x24   : > { %p1058_p0 = pneg %p1057_p13 }
  0x26   : > { %p1065_p10 = pnand %p1064_p5, %p1058_p0 }
  0x28   : > { %1068 = shalt.err (!%p1065_p10)
}
  0x29   : > { %950 = dma.hbm_to_vmem [thread:$0]  (!%p1255_p11), %s1424_s2, 512, %s167_s28, [#allocation6], %s1169_s30, %s1169_s30, %s1170_s5  }
  0x2a   : > { %s1278_s11 = sadd.s32 1, %s1165_s18   ;;  %s28_s12 = sadd.s32 1, %s1161_s17 }
  0x2b   : > { %s25_s13 = ssub.s32 %s1165_s18, %s1278_s11  ;;  %p35_p1 = scmp.ne.s32.totalorder %s1161_s17, %s1157_s16 }
  0x2c   : > { %p26_p2 = scmp.eq.s32.totalorder %s25_s13, 0  ;;  %p36_p6 = scmp.eq.s32.totalorder %s1165_s18, 0 }
  0x2d   : > { %p1435_p12 = scmp.eq.s32.totalorder %s1227_s19, 1  ;;  %p961_p7 = scmp.lt.s32.totalorder %s1165_s18, 2 }
  0x2e   : > { %s1294_s20 = scalar_select %p26_p2, %s1161_s17, %s28_s12  }
  0x2f   : > { %p1288_p3 = por %p1435_p12, %p35_p1  ;;  %p37_p9 = por %p36_p6, %p35_p1 }
  0x30   : > { %s183_s24 = sand.u32 1, %s1161_s17   ;;  %s853_s26 = sshll.u32 %s1165_s18, 7 }
  0x31   : > { %s1436_s14 = scalar_select %p1288_p3, 1, 0 }
  0x32   : > { %s852_s25 = sshll.u32 %s183_s24, 3  ;;  %s1301_s29 = scalar_lea.hbm %s1422_s0, %s853_s26 }
  0x33   : > { %s187_s30 = scalar_lea.vmem [#allocation2], %s852_s25  ;;  %p1303_p11 = pnand %p961_p7, %p37_p9 }
  0x34   : > { %s194_s5 = sshll.u32 %s187_s30, 4  ;;  %s184_s7 = scalar_lea.sflag [#allocation3], %s183_s24  ;;  %s195_s5 = int_to_ptr.vmem [resolvable:$true] %s194_s5 }
  0x35   : > { %s1069_s8 = scalar_lea.hbm %s1301_s29, 128  ;;  %p1071_p0 = pneg %p1303_p11 }
  0x36   : > { %p1070_p13 = scmp.ne.s32.totalorder %s1301_s29, %s1069_s8  ;;  %s1074_s12 = scalar_lea.hbm %s1422_s0, 256 }
  0x37   : > { %p1075_p1 = scmp.lt.s32.totalorder %s1301_s29, %s1422_s0  ;;  %p1076_p2 = scmp.lt.s32.totalorder %s1074_s12, %s1069_s8 }
  0x38   : > { %p1072_p5 = pnand %p1071_p0, %p1070_p13 }
  0x39   : > { %p1077_p6 = por %p1076_p2, %p1075_p1 }
  0x3a   : > { %p1073_p10 = pneg %p1072_p5 }
  0x3c   : > { %p1078_p12 = pnand %p1077_p6, %p1073_p10 }
  0x3e   : > { %1081 = shalt.err (!%p1078_p12)
}
  0x3f   : > { %s1082_s26 = scalar_lea.vmem %s195_s5, 128  ;;  %s1171_s24 = smov [#allocation2]  }
  0x40   : > { %p1083_p7 = scmp.ne.s32.totalorder %s195_s5, %s1082_s26  ;;  %s1087_s27 = sshll.u32 %s1171_s24, 4  ;;  %s1088_s27 = int_to_ptr.vmem [resolvable:$false] %s1087_s27 }
  0x41   : > { %s1089_s28 = scalar_lea.vmem %s1088_s27, 256  ;;  %p1090_p13 = scmp.lt.s32.totalorder %s195_s5, %s1088_s27 }
  0x42   : > { %p1085_p9 = pnand %p1083_p7, %p1071_p0  ;;  %p1091_p5 = scmp.lt.s32.totalorder %s1089_s28, %s1082_s26 }
  0x44   : > { %p1086_p3 = pneg %p1085_p9  ;;  %p1092_p4 = por %p1091_p5, %p1090_p13 }
  0x46   : > { %p1093_p8 = pnand %p1092_p4, %p1086_p3 }
  0x48   : > { %1096 = shalt.err (!%p1093_p8)
}
  0x49   : > { %954 = dma.hbm_to_vmem [thread:$0]  (!%p1303_p11), %s1301_s29, 128, %s195_s5, %s184_s7  }
  0x4a   : > { %p1438_p10 = scmp.ne.s32.totalorder %s1433_s23, 0 }
  0x4b   : > { %s1324_s30 = sand.u32 (!%p1438_p10), 1, %s1157_s16   ;;  %p1439_p4 = scmp.ne.s32.totalorder (!%p1438_p10), %s1431_s21, 0 }
  0x4c   : > { %203 = sbr.rel (%p1438_p10) target bundleno = 1629 (0x65d), region = 36  ;;  %s855_s8 = sshll.u32 (!%p1438_p10), %s1324_s30, 3 }
  0x4d   : > { %s206_s9 = scalar_lea.sflag (!%p1438_p10), [#allocation3], %s1324_s30  ;;  %s209_s10 = scalar_lea.vmem (!%p1438_p10), [#allocation2], %s855_s8 }
  0x51   : > { %1140 = dma.done.wait (%p1439_p4), %s206_s9, 128  }
  0x52   : > { %1142 = vsyncadd (%p1439_p4), %s206_s9, 4294967168  ;;  %p1440_p8 = scmp.eq.s32.totalorder %s1227_s19, 0 }
  0x54   : > { %1144 = dma.done.wait (%p1440_p8), [#allocation6], 1024   ;;  %p1441_p3 = pmov %p1440_p8 }
  0x55   : > { %v1172_v0 = vmov 0.0   ;;  %vm1173_vm0 = vmmov 0   ;;  %v246_v1 = vld [vmem:[#allocation5 + $0x18] sm:$0xff]  ;;  %v245_v2 = vld [vmem:[#allocation5 + $0x10] sm:$0xff]  ;;  %v244_v3 = vld [vmem:[#allocation5 + $0x8] sm:$0xff]  ;;  %vm247_vm1 = vcmask 261120  }
  0x56   : > { %1146 = vsyncadd (%p1441_p3), [#allocation6], 4294966272  ;;  %890 = vmatprep.subr.mxu0 %v1172_v0  ;;  %898 = vmatprep.mubr.msk.f32.mxu0 %vm1173_vm0, %v1172_v0  ;;  %v243_v4 = vld [vmem:[#allocation5] sm:$0xff]  ;;  %v242_v5 = vld [vmem:[%s209_s10] sm:$0xff]  ;;  %s1174_s21 = smov 64   ;;  %s1175_s23 = smov 96  }
  0x57   : > { %901 = vmatprep.subr.mxu1 %v1172_v0  ;;  %903 = vmatprep.mubr.msk.f32.mxu1 %vm1173_vm0, %v1172_v0  ;;  %s1176_s29 = smov 80   ;;  %s1177_s5 = smov 112   ;;  %vm325_vm2 = vcmask 130048   ;;  %vm401_vm3 = vcmask 64512   ;;  %v662_v32 = vld [vmem:[#allocation7 + $0x18] sm:$0xff]  ;;  %v661_v33 = vld [vmem:[#allocation7 + $0x10] sm:$0xff] }
  0x58   : > { %891 = vmatpush3.msra.mxu0 %v246_v1  ;;  %s1178_s6 = smov 48   ;;  %v660_v34 = vld [vmem:[#allocation7 + $0x8] sm:$0xff]  ;;  %v659_v36 = vld [vmem:[#allocation7] sm:$0xff]  ;;  %s1179_s7 = smov 16   ;;  %v866_v46 = vld [vmem:[%s1425_s3] ss:$0 sm:$0xff] }
  0x59   : > { %892 = vmatprep.subr.mxu0 %v1172_v0  ;;  %s869_s25 = sshll.u32 %s1227_s19, 7  ;;  %s241_s26 = scalar_lea.vmem [#allocation8], %s855_s8 }
  0x5a   : > { %893 = vmatpush3.msra.mxu0 %v245_v2  ;;  %s758_s24 = sshll.u32 %s241_s26, 4  ;;  %s1384_s9 = scalar_lea.hbm %s1426_s4, %s869_s25  ;;  %s759_s24 = int_to_ptr.vmem [resolvable:$true] %s758_s24 }
  0x5b   : > { %894 = vmatprep.subr.mxu0 %v1172_v0  ;;  %s745_s10 = scalar_lea.sflag [#allocation4], %s1324_s30  ;;  %p1442_p0 = scmp.ne.s32.totalorder %s1436_s14, 0 }
  0x5c   : > { %895 = vmatpush3.msra.mxu0 %v244_v3  ;;  %s1180_s19 = smov [#allocation8]  }
  0x5d   : > { %896 = vmatprep.subr.mxu0 %v1172_v0  ;;  %s1101_s8 = sshll.u32 %s1180_s19, 4  ;;  %s1102_s8 = int_to_ptr.vmem [resolvable:$false] %s1101_s8 }
  0x5e   : > { %897 = vmatpush3.msra.mxu0 %v243_v4  ;;  %p1104_p6 = scmp.lt.s32.totalorder %s759_s24, %s1102_s8 }
  0x5f   : > { %899 = vmatmul.mubr.msk.f32.vlgmr.msra.gmra.mxu0 %vm247_vm1, %v242_v5  ;;  %921 = vmatprep.subr.mxu0 %v1172_v0 }
  0x60   : > { %929 = vmatprep.mubr.msk.f32.mxu0 %vm1173_vm0, %v1172_v0  ;;  %922 = vmatpush3.msra.mxu0 %v662_v32 }
  0x61   : > { %923 = vmatprep.subr.mxu0 %v1172_v0 }
  0x62   : > { %924 = vmatpush3.msra.mxu0 %v661_v33 }
  0x63   : > { %925 = vmatprep.subr.mxu0 %v1172_v0 }
  0x64   : > { %926 = vmatpush3.msra.mxu0 %v660_v34 }
  0x65   : > { %927 = vmatprep.subr.mxu0 %v1172_v0 }
  0x66   : > { %928 = vmatpush3.msra.mxu0 %v659_v36 }
 0x11f   : > { %v317_v6 = vpop.f32.mrf.mxu0 }
 0x120   : > { %411 = vrot.lane.b32.xlu1 %v317_v6, %s1174_s21  ;;  %323 = vrot.lane.b32.xlu0 %v317_v6, %s1175_s23  ;;  %v321_v8 = vmul.f32 0.25, %v317_v6  ;;  %s1097_s21 = scalar_lea.vmem %s759_s24, 128  ;;  %s1103_s23 = scalar_lea.vmem %s1102_s8, 256 }
 0x121   : > { %v900_v7 = vpop.f32.mrf.mxu0  ;;  %p1098_p11 = scmp.ne.s32.totalorder %s759_s24, %s1097_s21  ;;  %p1105_p12 = scmp.lt.s32.totalorder %s1103_s23, %s1097_s21 }
 0x123   : > { %p1099_p1 = pnand %p1098_p11, %p1442_p0  ;;  %p1106_p7 = por %p1105_p12, %p1104_p6 }
 0x124   : > { %491 = vrot.lane.b32.xlu1 %v317_v6, %s1176_s29 }
 0x125   : > { %p1100_p2 = pneg %p1099_p1 }
 0x127   : > { %p1107_p9 = pnand %p1106_p7, %p1100_p2 }
 0x128   : > { %489 = vrot.lane.b32.xlu1 %v321_v8, %s1177_s5 }
 0x192   : > { %v324_v9 = vpop.permute.xlu0 %323  ;;  %v412_v10 = vpop.permute.xlu1 %411 }
 0x193   : > { %902 = vmatpush3.xpose.msk.msra.mxu1 %vm325_vm2, %v324_v9 }
 0x194   : > { %906 = vmatprep.subr.mxu1 %v1172_v0 }
 0x196   : > { %904 = vmatmul.mubr.msk.f32.vlgmr.msra.gmra.mxu1 %vm325_vm2, %v321_v8  ;;  %v492_v17 = vpop.permute.xlu1 %491 }
 0x197   : > { %907 = vmatpush3.msra.mxu1 %v412_v10  ;;  %908 = vmatprep.mubr.msk.f32.mxu1 %vm1173_vm0, %v1172_v0 }
 0x198   : > { %911 = vmatprep.subr.mxu1 %v1172_v0 }
 0x19a   : > { %v490_v19 = vpop.permute.xlu1 %489 }
 0x256   : > { %v397_v11 = vpop.f32.mrf.mxu1 }
 0x257   : > { %v402_v12 = vsel %vm401_vm3, %v397_v11, -inf }
 0x258   : > { %403 = vmax.xlane.f32.xlu0 %v402_v12  ;;  %v905_v13 = vpop.f32.mrf.mxu1 }
 0x26e   : > { %576 = vrot.lane.b32.xlu0 %v317_v6, %s1178_s6 }
 0x2e1   : > { %v404_v14 = vpop.xlane.xlu0 %403 }
 0x2e2   : > { %v405_v15 = vsub.f32 %v397_v11, %v404_v14 }
 0x2e4   : > { %v406_v16 = vmul.f32 1.442695, %v405_v15 }
 0x2e5   : > { %v577_v20 = vpop.permute.xlu0 %576 }
 0x2e6   : > { %1009 = vpow2.f32 %v406_v16 }
 0x2f3   : > { %v1010_v18 = vpop.eup %1009 }
 0x2f4   : > { %909 = vmatmul.mubr.msk.f32.vlgmr.msra.gmra.mxu1 %vm401_vm3, %v1010_v18  ;;  %v408_v31 = vsel %vm401_vm3, %v1010_v18, 0.0 }
 0x2f5   : > { %912 = vmatpush3.xpose.msk.msra.mxu1 %vm325_vm2, %v492_v17  ;;  %913 = vmatprep.mubr.msk.f32.mxu1 %vm1173_vm0, %v1172_v0 }
 0x2f6   : > { %916 = vmatprep.subr.mxu1 %v1172_v0 }
 0x2f8   : > { %914 = vmatmul.mubr.msk.f32.vlgmr.msra.gmra.mxu1 %vm325_vm2, %v490_v19 }
 0x2f9   : > { %917 = vmatpush3.msra.mxu1 %v577_v20  ;;  %918 = vmatprep.mubr.msk.f32.mxu1 %vm1173_vm0, %v1172_v0 }
 0x3b4   : > { %v483_v21 = vpop.f32.mrf.mxu1 }
 0x3b6   : > { %v910_v22 = vpop.f32.mrf.mxu1 }
 0x3b8   : > { %v563_v23 = vpop.f32.mrf.mxu1 }
 0x3b9   : > { %v567_v24 = vsel %vm401_vm3, %v563_v23, -inf }
 0x3ba   : > { %568 = vmax.xlane.f32.xlu1 %v567_v24  ;;  %v915_v25 = vpop.f32.mrf.mxu1 }
 0x443   : > { %v569_v26 = vpop.xlane.xlu1 %568 }
 0x444   : > { %v570_v27 = vsub.f32 %v563_v23, %v569_v26 }
 0x446   : > { %v571_v28 = vmul.f32 1.442695, %v570_v27 }
 0x448   : > { %1011 = vpow2.f32 %v571_v28 }
 0x455   : > { %v1012_v29 = vpop.eup %1011 }
 0x456   : > { %919 = vmatmul.mubr.msk.f32.vlgmr.msra.gmra.mxu1 %vm401_vm3, %v1012_v29  ;;  %v573_v30 = vsel %vm401_vm3, %v1012_v29, 0.0 }
 0x457   : > { %574 = vadd.xlane.f32.xlu1 %v573_v30 }
 0x45b   : > { %409 = vadd.xlane.f32.xlu1 %v408_v31 }
 0x4e0   : > { %v575_v35 = vpop.xlane.xlu1 %574 }
 0x4e1   : > { %1013 = vrcp.f32 %v575_v35 }
 0x4e4   : > { %v410_v41 = vpop.xlane.xlu1 %409 }
 0x4e5   : > { %1015 = vrcp.f32 %v410_v41 }
 0x4ee   : > { %v1014_v37 = vpop.eup %1013 }
 0x4f2   : > { %v1016_v42 = vpop.eup %1015 }
 0x4f3   : > { %v488_v43 = vmul.f32 %v1016_v42, %v483_v21 }
 0x516   : > { %v648_v38 = vpop.f32.mrf.mxu1 }
 0x517   : > { %v653_v39 = vmul.f32 %v1014_v37, %v648_v38 }
 0x518   : > { %v920_v40 = vpop.f32.mrf.mxu1 }
 0x519   : > { %655 = vrot.lane.b32.xlu1 %v653_v39, %s1179_s7 }
 0x58b   : > { %v656_v44 = vpop.permute.xlu1 %655 }
 0x58c   : > { %v658_v45 = vsel %vm325_vm2, %v488_v43, %v656_v44 }
 0x58d   : > { %930 = vmatmul.mubr.msk.f32.vlgmr.msra.gmra.mxu0 %vm247_vm1, %v658_v45 }
 0x64d   : > { %v739_v47 = vpop.f32.mrf.mxu0 }
 0x64e   : > { %v740_v48 = vadd.f32 %v866_v46, %v739_v47 }
 0x64f   : > { %v931_v49 = vpop.f32.mrf.mxu0 }
 0x650   : > { %743 = vst.msk [vmem:[%s241_s26] sm:$0xff] %vm247_vm1, %v740_v48 }
 0x651   : > { %1110 = shalt.err (!%p1107_p9)
}
 0x652   : > { %s1111_s29 = scalar_lea.hbm %s1384_s9, 128  ;;  %s1115_s6 = scalar_lea.hbm %s1426_s4, 256 }
 0x653   : > { %p1112_p13 = scmp.ne.s32.totalorder %s1384_s9, %s1111_s29  ;;  %p1116_p4 = scmp.lt.s32.totalorder %s1384_s9, %s1426_s4 }
 0x654   : > { %p1117_p8 = scmp.lt.s32.totalorder %s1115_s6, %s1111_s29 }
 0x655   : > { %p1113_p5 = pnand %p1112_p13, %p1442_p0 }
 0x656   : > { %p1118_p3 = por %p1117_p8, %p1116_p4 }
 0x657   : > { %p1114_p10 = pneg %p1113_p5 }
 0x659   : > { %p1119_p11 = pnand %p1118_p3, %p1114_p10 }
 0x65b   : > { %1122 = shalt.err (!%p1119_p11)
}
 0x65c   : > { %942 = dma.vmem_to_hbm [thread:$0]  (%p1442_p0), %s759_s24, 128, %s1384_s9, %s745_s10  }
 0x65d PF: > { %s770_s13 = sand.u32 1, %s1153_s15   ;;  %p1443_p1 = scmp.ne.s32.totalorder %s1432_s22, 0 }
 0x65e   : > { %p1444_p2 = scmp.ge.s32.totalorder %s1165_s18, 2  ;;  %s771_s25 = scalar_lea.sflag [#allocation4], %s770_s13 }
 0x660   : > { %p956_p6 = pnand %p1444_p2, %p1443_p1 }
 0x662   : > { %p957_p12 = pneg %p956_p6 }
 0x664   : > { %1148 = dma.done.wait (%p957_p12), %s771_s25, 128  }
 0x665   : > { %1150 = vsyncadd (%p957_p12), %s771_s25, 4294967168  ;;  %p18_p7 = scmp.ge.s32.totalorder %s1278_s11, 4   ;;  %s1445_s15 = smov %s1157_s16 }
 0x666   : > { %s1446_s16 = smov %s1161_s17  ;;  %s1447_s17 = smov %s1294_s20 }
 0x667   : > { %s1448_s18 = smov %s1278_s11  ;;  %20 = sbr.rel (!%p18_p7) target bundleno = 6 (0x6), region = 89 }
 0x66c   :  { %776 = vsyncpa [#allocation3], 1 }
 0x66d   :  { %778 = vsyncpa [#allocation3 + $0x1], 1 }
 0x66e   :  { %779 = vsyncpa [#allocation6], 1 }
 0x66f   :  { %780 = vsyncpa [#allocation4], 1 }
 0x670   :  { %782 = vsyncpa [#allocation4 + $0x1], 1 }

</bundles_post_ra>
